<compile_context>
chip_gen: v5e
topology: v5e:2x2
jax: 0.10.0
libtpu: 0.0.40
codegen_flags: <defaults>
</compile_context>

<pallas_src>
import math
import jax
import jax.numpy as jnp
from jax.experimental import pallas as pl
from jax.experimental.pallas import tpu as pltpu

# ---- problem sizes (small, consistent with the module) ----
B, S, D = 2, 8, 32          # batch, seq, d_model
H = 4                       # heads
DK = D // H                 # head dim
DFF = 64                    # feed-forward hidden
EPS = 1e-6
NEG_INF = -1e9


def _layernorm(v, alpha, bias):
    # torch.std() uses Bessel's correction (divide by N-1); normalize by (std + eps).
    mean = jnp.mean(v, axis=-1, keepdims=True)
    var = jnp.sum((v - mean) ** 2, axis=-1, keepdims=True) / (D - 1)
    std = jnp.sqrt(var)
    return alpha * (v - mean) / (std + EPS) + bias


def encoder_block_kernel(x_ref, mask_ref, wqkv_ref, bqkv_ref, wo_ref, bo_ref,
                         w1_ref, b1_ref, w2_ref, b2_ref, ln_ref, out_ref):
    """Single invocation: the whole problem (~55 KB) lives in VMEM."""
    x = x_ref[...].astype(jnp.float32)                     # [B*S, D]

    # ---- residual 1: self-attention on LN(x) ----
    ln1 = _layernorm(x, ln_ref[0], ln_ref[1])

    # Fused Q/K/V projection: one [B*S, D] x [D, 3D] matmul (lane dim 96 vs 32).
    qkv = jnp.dot(ln1, wqkv_ref[...], preferred_element_type=jnp.float32) + bqkv_ref[...]
    q, k, v = qkv[:, :D], qkv[:, D:2 * D], qkv[:, 2 * D:]

    # Mask -> additive bias, computed once and shared by all heads.
    mask_bias = jnp.where(mask_ref[...] == 0, NEG_INF, 0.0).astype(jnp.float32)  # [B,S,S]

    scale = 1.0 / math.sqrt(DK)
    ctx_parts = []
    for b in range(B):                                     # static unroll, B = 2
        qb = q[b * S:(b + 1) * S, :].reshape(S, H, DK)
        kb = k[b * S:(b + 1) * S, :].reshape(S, H, DK)
        vb = v[b * S:(b + 1) * S, :].reshape(S, H, DK)
        # All heads in one batched matmul instead of H tiny ones + concat.
        scores = jnp.einsum('qhd,khd->hqk', qb, kb,
                            preferred_element_type=jnp.float32) * scale   # [H,S,S]
        scores = scores + mask_bias[b][None, :, :]
        scores = scores - jnp.max(scores, axis=-1, keepdims=True)
        p = jnp.exp(scores)
        p = p * pl.reciprocal(jnp.sum(p, axis=-1, keepdims=True), approx=True)
        ctx = jnp.einsum('hqk,khd->qhd', p, vb,
                         preferred_element_type=jnp.float32)              # [S,H,DK]
        ctx_parts.append(ctx.reshape(S, D))
    attn = jnp.concatenate(ctx_parts, axis=0)              # [B*S, D] (sublane-axis concat)
    attn = jnp.dot(attn, wo_ref[...], preferred_element_type=jnp.float32) + bo_ref[...]

    # TODO(synk): dropout (attention probs / residual / FFN) is identity (eval mode, p=0).
    x1 = x + attn

    # ---- residual 2: feed-forward on LN(x1) ----
    ln2 = _layernorm(x1, ln_ref[2], ln_ref[3])
    hid = jnp.dot(ln2, w1_ref[...], preferred_element_type=jnp.float32) + b1_ref[...]
    hid = jnp.maximum(hid, 0.0)
    ffn = jnp.dot(hid, w2_ref[...], preferred_element_type=jnp.float32) + b2_ref[...]

    out_ref[...] = (x1 + ffn).astype(out_ref.dtype)


def encoder_block(x, mask, params):
    (wq, bq, wk, bk, wv, bv, wo, bo, w1, b1, w2, b2, ln) = params

    # Host-side repacking (layout plumbing, not compute).
    wqkv = jnp.concatenate([wq, wk, wv], axis=1)           # [D, 3D]
    bqkv = jnp.concatenate([bq, bk, bv], axis=1)           # [1, 3D]
    ln_flat = ln.reshape(4)                                # [a1, b1, a2, b2]
    x_flat = x.reshape(B * S, D)                           # flatten: 2x more sublanes/matmul

    vmem = pl.BlockSpec(memory_space=pltpu.MemorySpace.VMEM)
    smem = pl.BlockSpec(memory_space=pltpu.MemorySpace.SMEM)

    out_flat = pl.pallas_call(
        encoder_block_kernel,
        out_shape=jax.ShapeDtypeStruct((B * S, D), x.dtype),
        in_specs=[vmem, vmem,                              # x (flattened), mask
                  vmem, vmem,                              # Wqkv, bqkv (fused)
                  vmem, vmem,                              # Wo, bo
                  vmem, vmem,                              # W1, b1
                  vmem, vmem,                              # W2, b2
                  smem],                                   # LayerNorm scalars (4,)
        out_specs=vmem,
        # No grid: a single step; total data fits VMEM on v5e/v6e (128 MiB) and v7x (64 MiB).
    )(x_flat, mask, wqkv, bqkv, wo, bo, w1, b1, w2, b2, ln_flat)
    return out_flat.reshape(B, S, D)


def reference(x, mask, params):
    """Pure-JAX reference matching the PyTorch module's forward semantics."""
    (wq, bq, wk, bk, wv, bv, wo, bo, w1, b1, w2, b2, ln) = params

    def layernorm(v, alpha, bias):
        mean = jnp.mean(v, axis=-1, keepdims=True)
        var = jnp.sum((v - mean) ** 2, axis=-1, keepdims=True) / (D - 1)
        std = jnp.sqrt(var)
        return alpha * (v - mean) / (std + EPS) + bias

    ln1 = layernorm(x, ln[0, 0], ln[0, 1])
    q = ln1 @ wq + bq
    k = ln1 @ wk + bk
    v = ln1 @ wv + bv
    qh = q.reshape(B, S, H, DK).transpose(0, 2, 1, 3)
    kh = k.reshape(B, S, H, DK).transpose(0, 2, 1, 3)
    vh = v.reshape(B, S, H, DK).transpose(0, 2, 1, 3)
    scores = qh @ kh.transpose(0, 1, 3, 2) / math.sqrt(DK)
    scores = jnp.where(mask[:, None, :, :] == 0, NEG_INF, scores)
    p = jax.nn.softmax(scores, axis=-1)
    attn = (p @ vh).transpose(0, 2, 1, 3).reshape(B, S, D)
    attn = attn @ wo + bo
    x1 = x + attn
    ln2 = layernorm(x1, ln[1, 0], ln[1, 1])
    ffn = jnp.maximum(ln2 @ w1 + b1, 0.0) @ w2 + b2
    return x1 + ffn


def init_params(key):
    ks = jax.random.split(key, 12)

    def lin(kw, fan_in, fan_out):
        bound = 1.0 / math.sqrt(fan_in)
        return jax.random.uniform(kw, (fan_in, fan_out), jnp.float32, -bound, bound)

    wq = lin(ks[0], D, D); bq = jax.random.uniform(ks[1], (1, D), jnp.float32, -0.1, 0.1)
    wk = lin(ks[2], D, D); bk = jax.random.uniform(ks[3], (1, D), jnp.float32, -0.1, 0.1)
    wv = lin(ks[4], D, D); bv = jax.random.uniform(ks[5], (1, D), jnp.float32, -0.1, 0.1)
    wo = lin(ks[6], D, D); bo = jax.random.uniform(ks[7], (1, D), jnp.float32, -0.1, 0.1)
    w1 = lin(ks[8], D, DFF); b1 = jax.random.uniform(ks[9], (1, DFF), jnp.float32, -0.1, 0.1)
    w2 = lin(ks[10], DFF, D); b2 = jax.random.uniform(ks[11], (1, D), jnp.float32, -0.1, 0.1)
    # LayerNormalization init: alpha = 1, bias = 0 (scalars), for both residual norms.
    ln = jnp.array([[1.0, 0.0], [1.0, 0.0]], dtype=jnp.float32)
    return (wq, bq, wk, bk, wv, bv, wo, bo, w1, b1, w2, b2, ln)


if __name__ == "__main__":
    key = jax.random.PRNGKey(0)
    kx, kp = jax.random.split(key)
    x = jax.random.normal(kx, (B, S, D), dtype=jnp.float32)
    # causal mask (1 = keep, 0 = masked), broadcast over batch
    causal = (jnp.arange(S)[None, :] <= jnp.arange(S)[:, None]).astype(jnp.int32)
    mask = jnp.broadcast_to(causal, (B, S, S))
    params = init_params(kp)

    out = encoder_block(x, mask, params)
    out = jax.block_until_ready(out)

    ref = reference(x, mask, params)
    assert out.shape == (B, S, D)
    # 1e-3 tolerance: the approximate EUP reciprocal in the softmax denominator
    # perturbs results by ~1e-4 relative vs. the exact-division reference.
    assert jnp.allclose(out, ref, atol=1e-3, rtol=1e-3), float(jnp.max(jnp.abs(out - ref)))
    print("KERNEL_OK")
</pallas_src>

<mosaic_0001>
module attributes {stable_mosaic.version = 11 : i64} {
  func.func @encoder_block_kernel(%arg0: memref<16x32xf32, #tpu.memory_space<vmem>>, %arg1: memref<2x8x8xi32, #tpu.memory_space<vmem>>, %arg2: memref<32x96xf32, #tpu.memory_space<vmem>>, %arg3: memref<1x96xf32, #tpu.memory_space<vmem>>, %arg4: memref<32x32xf32, #tpu.memory_space<vmem>>, %arg5: memref<1x32xf32, #tpu.memory_space<vmem>>, %arg6: memref<32x64xf32, #tpu.memory_space<vmem>>, %arg7: memref<1x64xf32, #tpu.memory_space<vmem>>, %arg8: memref<64x32xf32, #tpu.memory_space<vmem>>, %arg9: memref<1x32xf32, #tpu.memory_space<vmem>>, %arg10: memref<4xf32, #tpu.memory_space<smem>>, %arg11: memref<16x32xf32, #tpu.memory_space<vmem>>) attributes {dimension_semantics = [], scalar_prefetch = 0 : i64, scratch_operands = 0 : i64, tpu.core_type = #tpu.core_type<tc>} {
    %c0 = arith.constant 0 : index
    %c0_0 = arith.constant 0 : index
    %0 = vector.load %arg0[%c0, %c0_0] : memref<16x32xf32, #tpu.memory_space<vmem>>, vector<16x32xf32>
    %c0_1 = arith.constant 0 : index
    %1 = memref.load %arg10[%c0_1] : memref<4xf32, #tpu.memory_space<smem>>
    %c1 = arith.constant 1 : index
    %2 = memref.load %arg10[%c1] : memref<4xf32, #tpu.memory_space<smem>>
    %cst = arith.constant dense<0.000000e+00> : vector<16xf32>
    %3 = vector.multi_reduction <add>, %0, %cst [1] : vector<16x32xf32> to vector<16xf32>
    %4 = vector.shape_cast %3 : vector<16xf32> to vector<16x1xf32>
    %cst_2 = arith.constant 3.200000e+01 : f32
    %5 = vector.broadcast %cst_2 : f32 to vector<16x1xf32>
    %6 = arith.divf %4, %5 : vector<16x1xf32>
    %7 = vector.broadcast %6 : vector<16x1xf32> to vector<16x32xf32>
    %8 = arith.subf %0, %7 : vector<16x32xf32>
    %9 = arith.mulf %8, %8 : vector<16x32xf32>
    %cst_3 = arith.constant dense<0.000000e+00> : vector<16xf32>
    %10 = vector.multi_reduction <add>, %9, %cst_3 [1] : vector<16x32xf32> to vector<16xf32>
    %11 = vector.shape_cast %10 : vector<16xf32> to vector<16x1xf32>
    %cst_4 = arith.constant 3.100000e+01 : f32
    %12 = vector.broadcast %cst_4 : f32 to vector<16x1xf32>
    %13 = arith.divf %11, %12 : vector<16x1xf32>
    %14 = math.sqrt %13 : vector<16x1xf32>
    %15 = vector.broadcast %6 : vector<16x1xf32> to vector<16x32xf32>
    %16 = arith.subf %0, %15 : vector<16x32xf32>
    %17 = vector.broadcast %1 : f32 to vector<16x32xf32>
    %18 = arith.mulf %17, %16 : vector<16x32xf32>
    %cst_5 = arith.constant 9.99999997E-7 : f32
    %19 = vector.broadcast %cst_5 : f32 to vector<16x1xf32>
    %20 = arith.addf %14, %19 : vector<16x1xf32>
    %21 = vector.broadcast %20 : vector<16x1xf32> to vector<16x32xf32>
    %22 = arith.divf %18, %21 : vector<16x32xf32>
    %23 = vector.broadcast %2 : f32 to vector<16x32xf32>
    %24 = arith.addf %22, %23 : vector<16x32xf32>
    %c0_6 = arith.constant 0 : index
    %c0_7 = arith.constant 0 : index
    %25 = vector.load %arg2[%c0_6, %c0_7] : memref<32x96xf32, #tpu.memory_space<vmem>>, vector<32x96xf32>
    %cst_8 = arith.constant dense<0.000000e+00> : vector<16x96xf32>
    %26 = tpu.matmul %24, %25, %cst_8 {dimension_numbers = #tpu.dot_dimension_numbers<[1], [0], [0], [1], [0, 0, 1, 1], [], []>} : vector<16x32xf32>, vector<32x96xf32>, vector<16x96xf32> -> vector<16x96xf32>
    %c0_9 = arith.constant 0 : index
    %c0_10 = arith.constant 0 : index
    %27 = vector.load %arg3[%c0_9, %c0_10] : memref<1x96xf32, #tpu.memory_space<vmem>>, vector<1x96xf32>
    %28 = vector.broadcast %27 : vector<1x96xf32> to vector<16x96xf32>
    %29 = arith.addf %26, %28 : vector<16x96xf32>
    %30 = vector.extract_strided_slice %29 {offsets = [0, 0], sizes = [16, 32], strides = [1, 1]} : vector<16x96xf32> to vector<16x32xf32>
    %31 = vector.extract_strided_slice %29 {offsets = [0, 32], sizes = [16, 32], strides = [1, 1]} : vector<16x96xf32> to vector<16x32xf32>
    %32 = vector.extract_strided_slice %29 {offsets = [0, 64], sizes = [16, 32], strides = [1, 1]} : vector<16x96xf32> to vector<16x32xf32>
    %c0_11 = arith.constant 0 : index
    %c0_12 = arith.constant 0 : index
    %c0_13 = arith.constant 0 : index
    %33 = vector.load %arg1[%c0_11, %c0_12, %c0_13] : memref<2x8x8xi32, #tpu.memory_space<vmem>>, vector<2x8x8xi32>
    %c0_i32 = arith.constant 0 : i32
    %34 = vector.broadcast %c0_i32 : i32 to vector<2x8x8xi32>
    %35 = arith.cmpi eq, %33, %34 : vector<2x8x8xi32>
    %cst_14 = arith.constant -1.000000e+09 : f32
    %cst_15 = arith.constant 0.000000e+00 : f32
    %36 = vector.broadcast %cst_14 : f32 to vector<2x8x8xf32>
    %37 = vector.broadcast %cst_15 : f32 to vector<2x8x8xf32>
    %38 = arith.select %35, %36, %37 : vector<2x8x8xi1>, vector<2x8x8xf32>
    %39 = vector.extract_strided_slice %30 {offsets = [0, 0], sizes = [8, 32], strides = [1, 1]} : vector<16x32xf32> to vector<8x32xf32>
    %40 = vector.shape_cast %39 : vector<8x32xf32> to vector<8x4x8xf32>
    %41 = vector.extract_strided_slice %31 {offsets = [0, 0], sizes = [8, 32], strides = [1, 1]} : vector<16x32xf32> to vector<8x32xf32>
    %42 = vector.shape_cast %41 : vector<8x32xf32> to vector<8x4x8xf32>
    %43 = vector.extract_strided_slice %32 {offsets = [0, 0], sizes = [8, 32], strides = [1, 1]} : vector<16x32xf32> to vector<8x32xf32>
    %44 = vector.shape_cast %43 : vector<8x32xf32> to vector<8x4x8xf32>
    "tpu.trace_start"() <{level = 10 : i32, message = "qhd,khd->hqk"}> : () -> ()
    %cst_16 = arith.constant dense<0.000000e+00> : vector<4x8x8xf32>
    %45 = tpu.matmul %40, %42, %cst_16 {dimension_numbers = #tpu.dot_dimension_numbers<[2], [2], [0], [0], [0, 1, 0, 0, 1, 0], [1], [1]>} : vector<8x4x8xf32>, vector<8x4x8xf32>, vector<4x8x8xf32> -> vector<4x8x8xf32>
    "tpu.trace_stop"() : () -> ()
    %cst_17 = arith.constant 0.353553385 : f32
    %46 = vector.broadcast %cst_17 : f32 to vector<4x8x8xf32>
    %47 = arith.mulf %45, %46 : vector<4x8x8xf32>
    %48 = vector.extract_strided_slice %38 {offsets = [0, 0, 0], sizes = [1, 8, 8], strides = [1, 1, 1]} : vector<2x8x8xf32> to vector<1x8x8xf32>
    %49 = vector.shape_cast %48 : vector<1x8x8xf32> to vector<8x8xf32>
    %50 = vector.shape_cast %49 : vector<8x8xf32> to vector<1x8x8xf32>
    %51 = vector.broadcast %50 : vector<1x8x8xf32> to vector<4x8x8xf32>
    %52 = arith.addf %47, %51 : vector<4x8x8xf32>
    %cst_18 = arith.constant dense<0xFF800000> : vector<4x8xf32>
    %53 = vector.multi_reduction <maximumf>, %52, %cst_18 [2] : vector<4x8x8xf32> to vector<4x8xf32>
    %54 = vector.shape_cast %53 : vector<4x8xf32> to vector<4x8x1xf32>
    %55 = vector.broadcast %54 : vector<4x8x1xf32> to vector<4x8x8xf32>
    %56 = arith.subf %52, %55 : vector<4x8x8xf32>
    %57 = math.exp %56 : vector<4x8x8xf32>
    %cst_19 = arith.constant dense<0.000000e+00> : vector<4x8xf32>
    %58 = vector.multi_reduction <add>, %57, %cst_19 [2] : vector<4x8x8xf32> to vector<4x8xf32>
    %59 = vector.shape_cast %58 : vector<4x8xf32> to vector<4x8x1xf32>
    %60 = tpu.reciprocal %59 {approx = true} : vector<4x8x1xf32> -> vector<4x8x1xf32>
    %61 = vector.broadcast %60 : vector<4x8x1xf32> to vector<4x8x8xf32>
    %62 = arith.mulf %57, %61 : vector<4x8x8xf32>
    "tpu.trace_start"() <{level = 10 : i32, message = "hqk,khd->qhd"}> : () -> ()
    %cst_20 = arith.constant dense<0.000000e+00> : vector<4x8x8xf32>
    %63 = tpu.matmul %44, %62, %cst_20 {dimension_numbers = #tpu.dot_dimension_numbers<[0], [2], [2], [1], [0, 1, 0, 2, 1, 1], [1], [0]>} : vector<8x4x8xf32>, vector<4x8x8xf32>, vector<4x8x8xf32> -> vector<4x8x8xf32>
    %64 = tpu.transpose %63, [2, 0, 1] : vector<4x8x8xf32> -> vector<8x4x8xf32>
    "tpu.trace_stop"() : () -> ()
    %65 = vector.shape_cast %64 : vector<8x4x8xf32> to vector<8x32xf32>
    %66 = vector.extract_strided_slice %30 {offsets = [8, 0], sizes = [8, 32], strides = [1, 1]} : vector<16x32xf32> to vector<8x32xf32>
    %67 = vector.shape_cast %66 : vector<8x32xf32> to vector<8x4x8xf32>
    %68 = vector.extract_strided_slice %31 {offsets = [8, 0], sizes = [8, 32], strides = [1, 1]} : vector<16x32xf32> to vector<8x32xf32>
    %69 = vector.shape_cast %68 : vector<8x32xf32> to vector<8x4x8xf32>
    %70 = vector.extract_strided_slice %32 {offsets = [8, 0], sizes = [8, 32], strides = [1, 1]} : vector<16x32xf32> to vector<8x32xf32>
    %71 = vector.shape_cast %70 : vector<8x32xf32> to vector<8x4x8xf32>
    "tpu.trace_start"() <{level = 10 : i32, message = "qhd,khd->hqk"}> : () -> ()
    %cst_21 = arith.constant dense<0.000000e+00> : vector<4x8x8xf32>
    %72 = tpu.matmul %67, %69, %cst_21 {dimension_numbers = #tpu.dot_dimension_numbers<[2], [2], [0], [0], [0, 1, 0, 0, 1, 0], [1], [1]>} : vector<8x4x8xf32>, vector<8x4x8xf32>, vector<4x8x8xf32> -> vector<4x8x8xf32>
    "tpu.trace_stop"() : () -> ()
    %cst_22 = arith.constant 0.353553385 : f32
    %73 = vector.broadcast %cst_22 : f32 to vector<4x8x8xf32>
    %74 = arith.mulf %72, %73 : vector<4x8x8xf32>
    %75 = vector.extract_strided_slice %38 {offsets = [1, 0, 0], sizes = [1, 8, 8], strides = [1, 1, 1]} : vector<2x8x8xf32> to vector<1x8x8xf32>
    %76 = vector.shape_cast %75 : vector<1x8x8xf32> to vector<8x8xf32>
    %77 = vector.shape_cast %76 : vector<8x8xf32> to vector<1x8x8xf32>
    %78 = vector.broadcast %77 : vector<1x8x8xf32> to vector<4x8x8xf32>
    %79 = arith.addf %74, %78 : vector<4x8x8xf32>
    %cst_23 = arith.constant dense<0xFF800000> : vector<4x8xf32>
    %80 = vector.multi_reduction <maximumf>, %79, %cst_23 [2] : vector<4x8x8xf32> to vector<4x8xf32>
    %81 = vector.shape_cast %80 : vector<4x8xf32> to vector<4x8x1xf32>
    %82 = vector.broadcast %81 : vector<4x8x1xf32> to vector<4x8x8xf32>
    %83 = arith.subf %79, %82 : vector<4x8x8xf32>
    %84 = math.exp %83 : vector<4x8x8xf32>
    %cst_24 = arith.constant dense<0.000000e+00> : vector<4x8xf32>
    %85 = vector.multi_reduction <add>, %84, %cst_24 [2] : vector<4x8x8xf32> to vector<4x8xf32>
    %86 = vector.shape_cast %85 : vector<4x8xf32> to vector<4x8x1xf32>
    %87 = tpu.reciprocal %86 {approx = true} : vector<4x8x1xf32> -> vector<4x8x1xf32>
    %88 = vector.broadcast %87 : vector<4x8x1xf32> to vector<4x8x8xf32>
    %89 = arith.mulf %84, %88 : vector<4x8x8xf32>
    "tpu.trace_start"() <{level = 10 : i32, message = "hqk,khd->qhd"}> : () -> ()
    %cst_25 = arith.constant dense<0.000000e+00> : vector<4x8x8xf32>
    %90 = tpu.matmul %71, %89, %cst_25 {dimension_numbers = #tpu.dot_dimension_numbers<[0], [2], [2], [1], [0, 1, 0, 2, 1, 1], [1], [0]>} : vector<8x4x8xf32>, vector<4x8x8xf32>, vector<4x8x8xf32> -> vector<4x8x8xf32>
    %91 = tpu.transpose %90, [2, 0, 1] : vector<4x8x8xf32> -> vector<8x4x8xf32>
    "tpu.trace_stop"() : () -> ()
    %92 = vector.shape_cast %91 : vector<8x4x8xf32> to vector<8x32xf32>
    %93 = tpu.concatenate %65, %92 in 0 : vector<8x32xf32>, vector<8x32xf32> -> vector<16x32xf32>
    %c0_26 = arith.constant 0 : index
    %c0_27 = arith.constant 0 : index
    %94 = vector.load %arg4[%c0_26, %c0_27] : memref<32x32xf32, #tpu.memory_space<vmem>>, vector<32x32xf32>
    %cst_28 = arith.constant dense<0.000000e+00> : vector<16x32xf32>
    %95 = tpu.matmul %93, %94, %cst_28 {dimension_numbers = #tpu.dot_dimension_numbers<[1], [0], [0], [1], [0, 0, 1, 1], [], []>} : vector<16x32xf32>, vector<32x32xf32>, vector<16x32xf32> -> vector<16x32xf32>
    %c0_29 = arith.constant 0 : index
    %c0_30 = arith.constant 0 : index
    %96 = vector.load %arg5[%c0_29, %c0_30] : memref<1x32xf32, #tpu.memory_space<vmem>>, vector<1x32xf32>
    %97 = vector.broadcast %96 : vector<1x32xf32> to vector<16x32xf32>
    %98 = arith.addf %95, %97 : vector<16x32xf32>
    %99 = arith.addf %0, %98 : vector<16x32xf32>
    %c2 = arith.constant 2 : index
    %100 = memref.load %arg10[%c2] : memref<4xf32, #tpu.memory_space<smem>>
    %c3 = arith.constant 3 : index
    %101 = memref.load %arg10[%c3] : memref<4xf32, #tpu.memory_space<smem>>
    %cst_31 = arith.constant dense<0.000000e+00> : vector<16xf32>
    %102 = vector.multi_reduction <add>, %99, %cst_31 [1] : vector<16x32xf32> to vector<16xf32>
    %103 = vector.shape_cast %102 : vector<16xf32> to vector<16x1xf32>
    %cst_32 = arith.constant 3.200000e+01 : f32
    %104 = vector.broadcast %cst_32 : f32 to vector<16x1xf32>
    %105 = arith.divf %103, %104 : vector<16x1xf32>
    %106 = vector.broadcast %105 : vector<16x1xf32> to vector<16x32xf32>
    %107 = arith.subf %99, %106 : vector<16x32xf32>
    %108 = arith.mulf %107, %107 : vector<16x32xf32>
    %cst_33 = arith.constant dense<0.000000e+00> : vector<16xf32>
    %109 = vector.multi_reduction <add>, %108, %cst_33 [1] : vector<16x32xf32> to vector<16xf32>
    %110 = vector.shape_cast %109 : vector<16xf32> to vector<16x1xf32>
    %cst_34 = arith.constant 3.100000e+01 : f32
    %111 = vector.broadcast %cst_34 : f32 to vector<16x1xf32>
    %112 = arith.divf %110, %111 : vector<16x1xf32>
    %113 = math.sqrt %112 : vector<16x1xf32>
    %114 = vector.broadcast %105 : vector<16x1xf32> to vector<16x32xf32>
    %115 = arith.subf %99, %114 : vector<16x32xf32>
    %116 = vector.broadcast %100 : f32 to vector<16x32xf32>
    %117 = arith.mulf %116, %115 : vector<16x32xf32>
    %cst_35 = arith.constant 9.99999997E-7 : f32
    %118 = vector.broadcast %cst_35 : f32 to vector<16x1xf32>
    %119 = arith.addf %113, %118 : vector<16x1xf32>
    %120 = vector.broadcast %119 : vector<16x1xf32> to vector<16x32xf32>
    %121 = arith.divf %117, %120 : vector<16x32xf32>
    %122 = vector.broadcast %101 : f32 to vector<16x32xf32>
    %123 = arith.addf %121, %122 : vector<16x32xf32>
    %c0_36 = arith.constant 0 : index
    %c0_37 = arith.constant 0 : index
    %124 = vector.load %arg6[%c0_36, %c0_37] : memref<32x64xf32, #tpu.memory_space<vmem>>, vector<32x64xf32>
    %cst_38 = arith.constant dense<0.000000e+00> : vector<16x64xf32>
    %125 = tpu.matmul %123, %124, %cst_38 {dimension_numbers = #tpu.dot_dimension_numbers<[1], [0], [0], [1], [0, 0, 1, 1], [], []>} : vector<16x32xf32>, vector<32x64xf32>, vector<16x64xf32> -> vector<16x64xf32>
    %c0_39 = arith.constant 0 : index
    %c0_40 = arith.constant 0 : index
    %126 = vector.load %arg7[%c0_39, %c0_40] : memref<1x64xf32, #tpu.memory_space<vmem>>, vector<1x64xf32>
    %127 = vector.broadcast %126 : vector<1x64xf32> to vector<16x64xf32>
    %128 = arith.addf %125, %127 : vector<16x64xf32>
    %cst_41 = arith.constant 0.000000e+00 : f32
    %129 = vector.broadcast %cst_41 : f32 to vector<16x64xf32>
    %130 = arith.maximumf %128, %129 : vector<16x64xf32>
    %c0_42 = arith.constant 0 : index
    %c0_43 = arith.constant 0 : index
    %131 = vector.load %arg8[%c0_42, %c0_43] : memref<64x32xf32, #tpu.memory_space<vmem>>, vector<64x32xf32>
    %cst_44 = arith.constant dense<0.000000e+00> : vector<16x32xf32>
    %132 = tpu.matmul %130, %131, %cst_44 {dimension_numbers = #tpu.dot_dimension_numbers<[1], [0], [0], [1], [0, 0, 1, 1], [], []>} : vector<16x64xf32>, vector<64x32xf32>, vector<16x32xf32> -> vector<16x32xf32>
    %c0_45 = arith.constant 0 : index
    %c0_46 = arith.constant 0 : index
    %133 = vector.load %arg9[%c0_45, %c0_46] : memref<1x32xf32, #tpu.memory_space<vmem>>, vector<1x32xf32>
    %134 = vector.broadcast %133 : vector<1x32xf32> to vector<16x32xf32>
    %135 = arith.addf %132, %134 : vector<16x32xf32>
    %136 = arith.addf %99, %135 : vector<16x32xf32>
    %c0_47 = arith.constant 0 : index
    %c0_48 = arith.constant 0 : index
    %137 = vector.load %arg11[%c0_47, %c0_48] : memref<16x32xf32, #tpu.memory_space<vmem>>, vector<16x32xf32>
    tpu.vector_store %arg11[%c0_47, %c0_48], %136 {strides = array<i32>} : memref<16x32xf32, #tpu.memory_space<vmem>>, vector<16x32xf32>,
    return
  }
}

</mosaic_0001>

<bundles_post_ra>
// kernel: tpu_custom_call.1
= control target key start
LH: loop header
LB: loop body
LE: loop exit
PB: predicated region body
PF: predicated region fallthrough
CT: control target
= control target key end

     0   :  { %16 = vsyncpa [#allocation3], 0  ;;  %s2675_s0 = inlined_call_operand.hbm [shape: f32[16,32], index: 0, kind: input, shape index: {}]   ;;  %s2676_s1 = inlined_call_operand.hbm [shape: s32[2,8,8], index: 1, kind: input, shape index: {}]   ;;  %s2677_s2 = inlined_call_operand.vmem [shape: f32[32,96], index: 2, kind: input, shape index: {}]   ;;  %s2678_s3 = inlined_call_operand.vmem [shape: f32[1,96], index: 3, kind: input, shape index: {}]   ;;  %s2679_s4 = inlined_call_operand.vmem [shape: f32[32,32], index: 4, kind: input, shape index: {}]   ;;  %s2680_s5 = inlined_call_operand.vmem [shape: f32[1,32], index: 5, kind: input, shape index: {}]   ;;  %s2681_s6 = inlined_call_operand.vmem [shape: f32[32,64], index: 6, kind: input, shape index: {}]   ;;  %s2682_s7 = inlined_call_operand.vmem [shape: f32[1,64], index: 7, kind: input, shape index: {}]   ;;  %s2683_s8 = inlined_call_operand.vmem [shape: f32[64,32], index: 8, kind: input, shape index: {}]   ;;  %s2684_s9 = inlined_call_operand.vmem [shape: f32[1,32], index: 9, kind: input, shape index: {}]   ;;  %s2685_s10 = inlined_call_operand.vmem [shape: f32[4], index: 10, kind: input, shape index: {}]   ;;  %s2686_s11 = inlined_call_operand.hbm [shape: f32[16,32], index: 11, kind: output, shape index: {}]  }
   0x1   :  { %17 = vsyncpa [#allocation7], 0 }
   0x2   :  { %18 = vsyncpa [#allocation5], 0 }
   0x3   :  { %19 = vsyncpa [#allocation4], 0  ;;  %s24_s19 = sshll.u32 %s2675_s0, 4  ;;  %s2249_s20 = smov [#allocation2]   ;;  %s25_s19 = int_to_ptr.hbm [resolvable:$true] %s24_s19 }
   0x4   :  { %s26_s21 = sshll.u32 %s2249_s20, 4  ;;  %s37_s24 = sshll.u32 %s2676_s1, 4  ;;  %s27_s21 = int_to_ptr.vmem [resolvable:$true] %s26_s21  ;;  %s38_s24 = int_to_ptr.hbm [resolvable:$true] %s37_s24 }
   0x5   :  { %s2250_s25 = smov 128   ;;  %s2251_s26 = smov 8  }
   0x6   :  { %32 = dma.hbm_to_vmem [thread:$0]  %s25_s19, 256, %s27_s21, [#allocation3], %s2250_s25, %s2250_s25, %s2251_s26  }
   0x7   :  { %s2252_s27 = smov [#allocation6]   ;;  %s67_s0 = sshll.u32 %s2685_s10, 4  ;;  %s68_s0 = int_to_ptr.vmem [resolvable:$true] %s67_s0 }
   0x8   :  { %s39_s28 = sshll.u32 %s2252_s27, 4  ;;  %s2253_s1 = smov [#allocation8]   ;;  %s40_s28 = int_to_ptr.vmem [resolvable:$true] %s39_s28 }
   0x9   :  { %45 = dma.hbm_to_vmem [thread:$0]  %s38_s24, 256, %s40_s28, [#allocation7], %s2250_s25, %s2250_s25, %s2251_s26  }
   0xa   :  { %70 = dma.vmem_to_smem %s68_s0, 16, %s2253_s1, [#allocation5]  }
   0xb   :  { %2241 = dma.done.wait [#allocation3], 256  }
   0xc   :  { %2242 = vsyncadd [#allocation3], 4294967040 }
   0xd   :  { %2243 = dma.done.wait [#allocation7], 256  }
   0xe   :  { %2244 = vsyncadd [#allocation7], 4294967040 }
   0xf   :  { %2245 = dma.done.wait [#allocation5], 16  }
  0x10   :  { %2246 = vsyncadd [#allocation5], 4294967280 }
  0x11   :  { %83 = sfence }
  0x12   :  { %v85_v0 = vld [vmem:[#allocation2 + $0x8] sm:$0xff]  ;;  %vm88_vm0 = vcmask 261120   ;;  %v84_v1 = vld [vmem:[#allocation2] sm:$0xff]  ;;  %v2254_v4 = vmov 32.0   ;;  %v2255_v21 = vmov 31.0   ;;  %v188_v25 = vld [vmem:[%s2677_s2 + $0x18] sm:$0xff] }
  0x13   :  { %v92_v2 = vsel %vm88_vm0, %v85_v0, 0.0  ;;  %v89_v3 = vsel %vm88_vm0, %v84_v1, 0.0  ;;  %2103 = vrcp.f32 %v2254_v4  ;;  %v187_v26 = vld [vmem:[%s2677_s2 + $0x10] sm:$0xff]  ;;  %211 = vmatpush.msra.mxu0 %v188_v25  ;;  %v186_v28 = vld [vmem:[%s2677_s2 + $0x8] sm:$0xff]  ;;  %v185_v29 = vld [vmem:[%s2677_s2] sm:$0xff]  ;;  %s2374_s2 = sld [smem:[#allocation8]] }
  0x14   :  { %93 = vadd.xlane.f32.xlu1 %v92_v2  ;;  %90 = vadd.xlane.f32.xlu0 %v89_v3  ;;  %2105 = vrcp.f32 %v2255_v21  ;;  %s2376_s19 = sld [smem:[#allocation8 + $0x1]]  ;;  %s2256_s22 = smov 96   ;;  %vm375_vm15 = vcmask 64512  }
  0x15   :  { %212 = vmatpush.msra.mxu0 %v187_v26  ;;  %s2257_s23 = smov 104   ;;  %s2258_s24 = smov 120  }
  0x16   :  { %s2259_s27 = smov 64   ;;  %s2260_s28 = smov 112  }
  0x17   :  { %213 = vmatpush.msra.mxu0 %v186_v28  ;;  %s2265_s29 = smov 24  }
  0x19   :  { %v2104_v5 = vpop.eup %2103  ;;  %214 = vmatpush.msra.mxu0 %v185_v29  ;;  %v147_v4 = vstv %s2374_s2 }
  0x1a   :  { %v96_v6 = vmul.f32 32.0, %v2104_v5  ;;  %vm100_vm1 = vweird.f32 %v2104_v5  ;;  %v2106_v22 = vpop.eup %2105 }
  0x1b   :  { %v115_v23 = vmul.f32 31.0, %v2106_v22  ;;  %vm119_vm2 = vweird.f32 %v2106_v22 }
  0x1c   :  { %v97_v7 = vsub.f32 1.0, %v96_v6 }
  0x1d   :  { %v116_v24 = vsub.f32 1.0, %v115_v23 }
  0x1e   :  { %v98_v8 = vmul.f32 %v2104_v5, %v97_v7 }
  0x1f   :  { %v117_v27 = vmul.f32 %v2106_v22, %v116_v24 }
  0x20   :  { %v99_v9 = vadd.f32 %v2104_v5, %v98_v8 }
  0x21   :  { %v118_v30 = vadd.f32 %v2106_v22, %v117_v27 }
  0x22   :  { %v2344_v10 = vsel %vm100_vm1, %v2104_v5, %v99_v9 }
  0x23   :  { %v2370_v31 = vsel %vm119_vm2, %v2106_v22, %v118_v30 }
  0x87   :  { %v94_v11 = vpop.xlane.xlu1 %93  ;;  %v91_v12 = vpop.xlane.xlu0 %90 }
  0x88   :  { %v103_v13 = vmul.f32 %v2344_v10, %v94_v11  ;;  %v102_v14 = vmul.f32 %v2344_v10, %v91_v12 }
  0x8a   :  { %v2348_v15 = vsub.f32 %v85_v0, %v103_v13  ;;  %v2350_v16 = vsub.f32 %v84_v1, %v102_v14  ;;  %v182_v14 = vstv %s2376_s19 }
  0x8c   :  { %v107_v17 = vmul.f32 %v2348_v15, %v2348_v15  ;;  %v106_v18 = vmul.f32 %v2350_v16, %v2350_v16  ;;  %v148_v11 = vmul.f32 %v147_v4, %v2350_v16  ;;  %v149_v22 = vmul.f32 %v147_v4, %v2348_v15  ;;  %v2099_v16 = vld [vmem:[%s2678_s3] ss:$0 sm:$0xff]  ;;  %s2264_s3 = smov 16  }
  0x8e   :  { %v111_v19 = vsel %vm88_vm0, %v107_v17, 0.0  ;;  %v108_v20 = vsel %vm88_vm0, %v106_v18, 0.0 }
  0x8f   :  { %112 = vadd.xlane.f32.xlu2 %v111_v19  ;;  %109 = vadd.xlane.f32.xlu0 %v108_v20 }
 0x102   :  { %v113_v32 = vpop.xlane.xlu2 %112  ;;  %v110_v33 = vpop.xlane.xlu0 %109 }
 0x103   :  { %v122_v34 = vmul.f32 %v2370_v31, %v113_v32  ;;  %v121_v35 = vmul.f32 %v2370_v31, %v110_v33 }
 0x105   :  { %2107 = vrsqrt.f32 %v122_v34  ;;  %vm142_vm3 = vcmp.eq.f32.partialorder %v122_v34, inf  ;;  %v145_v47 = vand.u32 2147483648, %v122_v34  ;;  %vm144_vm4 = vcmp.eq.f32.partialorder %v122_v34, 0.0 }
 0x106   :  { %2109 = vrsqrt.f32 %v121_v35  ;;  %vm130_vm5 = vcmp.eq.f32.partialorder %v121_v35, inf  ;;  %v133_v51 = vand.u32 2147483648, %v121_v35  ;;  %vm132_vm6 = vcmp.eq.f32.partialorder %v121_v35, 0.0 }
 0x10b   :  { %v2108_v36 = vpop.eup %2107 }
 0x10c   :  { %v2110_v37 = vpop.eup %2109  ;;  %v136_v38 = vmul.f32 %v2108_v36, %v122_v34 }
 0x10d   :  { %v124_v39 = vmul.f32 %v2110_v37, %v121_v35 }
 0x10e   :  { %v137_v40 = vmul.f32 %v2108_v36, %v136_v38 }
 0x10f   :  { %v125_v41 = vmul.f32 %v2110_v37, %v124_v39 }
 0x110   :  { %v138_v42 = vmul.f32 0.5, %v137_v40 }
 0x111   :  { %v126_v43 = vmul.f32 0.5, %v125_v41 }
 0x112   :  { %v139_v44 = vsub.f32 1.5, %v138_v42 }
 0x113   :  { %v127_v45 = vsub.f32 1.5, %v126_v43 }
 0x114   :  { %v140_v46 = vmul.f32 %v2108_v36, %v139_v44 }
 0x115   :  { %v128_v48 = vmul.f32 %v2110_v37, %v127_v45  ;;  %v222_v45 = vld [vmem:[#allocation6] sm:$0xff] }
 0x116   :  { %v141_v49 = vmul.f32 %v140_v46, %v122_v34  ;;  %vm224_vm1 = vcmp.eq.s32.totalorder %v222_v45, 0 }
 0x117   :  { %v129_v50 = vmul.f32 %v128_v48, %v121_v35 }
 0x118   :  { %v143_v52 = vsel %vm142_vm3, %v122_v34, %v141_v49  ;;  %vm889_vm3 = vcmask 1047556  }
 0x119   :  { %v131_v53 = vsel %vm130_vm5, %v121_v35, %v129_v50  ;;  %v146_v54 = vsel %vm144_vm4, %v145_v47, %v143_v52  ;;  %v2261_v47 = vmov 0.0   ;;  %vm1012_vm4 = vcmask 130048  }
 0x11a   :  { %v134_v55 = vsel %vm132_vm6, %v133_v51, %v131_v53  ;;  %v151_v56 = vadd.f32 1e-06, %v146_v54  ;;  %v226_v48 = vsel %vm224_vm1, -1e+09, %v2261_v47  ;;  %vm1014_vm5 = vcmask 195584  }
 0x11b   :  { %v150_v57 = vadd.f32 1e-06, %v134_v55 }
 0x11c   :  { %2111 = vrcp.f32 %v151_v56  ;;  %vm172_vm7 = vweird.f32 %v151_v56  ;;  %v178_v5 = vand.u32 2147483648, %v151_v56  ;;  %v176_v8 = vand.u32 2147483647, %v151_v56 }
 0x11d   :  { %2113 = vrcp.f32 %v150_v57  ;;  %v163_v0 = vand.u32 2147483648, %v150_v57  ;;  %v161_v3 = vand.u32 2147483647, %v150_v57  ;;  %vm157_vm10 = vweird.f32 %v150_v57 }
 0x11e   :  { %v179_v17 = vor.u32 1.1754944e-38, %v178_v5  ;;  %vm177_vm14 = vcmp.eq.f32.partialorder %v176_v8, 8.507059e+37 }
 0x11f   :  { %v164_v9 = vor.u32 1.1754944e-38, %v163_v0  ;;  %vm162_vm13 = vcmp.eq.f32.partialorder %v161_v3, 8.507059e+37 }
 0x122   :  { %v2112_v58 = vpop.eup %2111 }
 0x123   :  { %v2114_v59 = vpop.eup %2113  ;;  %v168_v60 = vmul.f32 %v2112_v58, %v151_v56  ;;  %vm173_vm8 = vweird.f32 %v2112_v58 }
 0x124   :  { %v153_v61 = vmul.f32 %v2114_v59, %v150_v57  ;;  %vm158_vm9 = vweird.f32 %v2114_v59  ;;  %vm174_vm11 = vmor %vm172_vm7, %vm173_vm8 }
 0x125   :  { %v169_v62 = vsub.f32 1.0, %v168_v60  ;;  %vm159_vm12 = vmor %vm157_vm10, %vm158_vm9 }
 0x126   :  { %v154_v63 = vsub.f32 1.0, %v153_v61 }
 0x127   :  { %v170_v1 = vmul.f32 %v2112_v58, %v169_v62 }
 0x128   :  { %v155_v2 = vmul.f32 %v2114_v59, %v154_v63 }
 0x129   :  { %v171_v7 = vadd.f32 %v2112_v58, %v170_v1 }
 0x12a   :  { %v156_v6 = vadd.f32 %v2114_v59, %v155_v2 }
 0x12b   :  { %v175_v19 = vsel %vm174_vm11, %v2112_v58, %v171_v7 }
 0x12c   :  { %v160_v12 = vsel %vm159_vm12, %v2114_v59, %v156_v6  ;;  %v180_v21 = vsel %vm177_vm14, %v179_v17, %v175_v19 }
 0x12d   :  { %v165_v13 = vsel %vm162_vm13, %v164_v9, %v160_v12  ;;  %v181_v23 = vmul.f32 %v180_v21, %v149_v22 }
 0x12e   :  { %v166_v18 = vmul.f32 %v165_v13, %v148_v11 }
 0x12f   :  { %v184_v24 = vadd.f32 %v182_v14, %v181_v23 }
 0x130   :  { %v183_v20 = vadd.f32 %v182_v14, %v166_v18 }
 0x132   :  { %2030 = vmatmul.msk.f32.vlgmr.msra.gmra.mxu0 %vm88_vm0, %v183_v20 }
 0x13a   :  { %2031 = vmatmul.msk.f32.gmra.mxu0 %vm88_vm0, %v184_v24 }
 0x1af   :  { %v216_v25 = vpop.f32.mrf.mxu0 }
 0x1b0   :  { %v217_v26 = vadd.f32 %v2099_v16, %v216_v25 }
 0x1b2   :  { %235 = vrot.lane.b32.xlu0 %v217_v26, %s2256_s22  ;;  %233 = vrot.lane.b32.xlu2 %v217_v26, %s2257_s23 }
 0x1b3   :  { %229 = vrot.lane.b32.xlu1 %v217_v26, %s2258_s24 }
 0x1b7   :  { %v219_v15 = vpop.f32.mrf.mxu0 }
 0x1b8   :  { %v2388_v27 = vadd.f32 %v2099_v16, %v219_v15 }
 0x1ba   :  { %516 = vrot.lane.b32.xlu0 %v217_v26, %s2259_s27  ;;  %231 = vrot.lane.b32.xlu2 %v217_v26, %s2260_s28 }
 0x1bb   :  { %1019 = vrot.lane.b32.xlu1 %v2388_v27, %s2260_s28 }
 0x1c2   :  { %1021 = vrot.lane.b32.xlu0 %v2388_v27, %s2257_s23  ;;  %1017 = vrot.lane.b32.xlu2 %v2388_v27, %s2258_s24  ;;  %s2627_s23 = sld [smem:[#allocation8 + $0x3]] }
 0x20c   :  { %v2394_v28 = vpop.permute.xlu2 %233 }
 0x20d   :  { %241 = vrot.lane.b32.xlu0 %v2394_v28, %s2256_s22 }
 0x214   :  { %v232_v30 = vpop.permute.xlu2 %231 }
 0x21c   :  { %v2407_v40 = vpop.permute.xlu2 %1017 }
 0x224   :  { %v236_v32 = vpop.permute.xlu0 %235 }
 0x225   :  { %v230_v29 = vpop.permute.xlu1 %229 }
 0x226   :  { %237 = vrot.lane.b32.xlu1 %v230_v29, %s2256_s22 }
 0x22c   :  { %v517_v33 = vpop.permute.xlu0 %516 }
 0x22d   :  { %v2403_v36 = vpop.permute.xlu1 %1019 }
 0x22e   :  { %239 = vrot.lane.b32.xlu1 %v232_v30, %s2256_s22  ;;  %v2087_v6 = vpack.i.bf16 %v2407_v40, %v2403_v36 }
 0x22f   :  { %247 = vxpose.xlu0.b32.start.end [1/1] (short) (narrow) %v236_v32, 8 }
 0x234   :  { %v2401_v34 = vpop.permute.xlu0 %1021 }
 0x235   :  { %v2082_v52 = vpack.i.bf16 %v2401_v34, %v2388_v27 }
 0x236   :  { %518 = vrot.lane.b32.xlu1 %v230_v29, %s2259_s27 }
 0x27f   :  { %v242_v35 = vpop.permute.xlu0 %241 }
 0x280   :  { %343 = vxpose.xlu2.b32.start.end [1/1] (short) (narrow) %v242_v35, 8 }
 0x298   :  { %v238_v37 = vpop.permute.xlu1 %237 }
 0x299   :  { %279 = vxpose.xlu1.b32.start.end [1/1] (short) (narrow) %v238_v37, 8 }
 0x2a0   :  { %v240_v38 = vpop.permute.xlu1 %239 }
 0x2a1   :  { %311 = vxpose.xlu0.b32.start.end [1/1] (short) (narrow) %v240_v38, 8 }
 0x2a8   :  { %v519_v42 = vpop.permute.xlu1 %518 }
 0x2d3   :  { %v263_v39 = vpop.trf.xlu0 }
 0x2d4   :  { %393 = vmatpush.msra.mxu2 %v263_v39 }
 0x2d5   :  { %2032 = vmatmul.msk.f32.vlgmr.msra.gmra.mxu2 %vm375_vm15, %v217_v26 }
 0x2f3   :  { %520 = vrot.lane.b32.xlu1 %v232_v30, %s2259_s27 }
 0x319   :  { %v359_v41 = vpop.trf.xlu2 }
 0x31a   :  { %459 = vmatpush.msra.mxu1 %v359_v41 }
 0x31b   :  { %2035 = vmatmul.msk.f32.vlgmr.msra.gmra.mxu1 %vm375_vm15, %v2394_v28 }
 0x33d   :  { %v295_v43 = vpop.trf.xlu1 }
 0x33e   :  { %415 = vmatpush.msrb.mxu2 %v295_v43 }
 0x33f   :  { %2033 = vmatmul.msk.f32.vlgmr.msrb.gmra.mxu2 %vm375_vm15, %v230_v29 }
 0x345   :  { %v327_v44 = vpop.trf.xlu0 }
 0x346   :  { %437 = vmatpush.msra.mxu3 %v327_v44 }
 0x347   :  { %2034 = vmatmul.msk.f32.vlgmr.msra.gmra.mxu3 %vm375_vm15, %v232_v30 }
 0x358   :  { %v395_v46 = vpop.f32.mrf.mxu2 }
 0x359   :  { %v464_v49 = vmul.f32 0.35355338, %v395_v46 }
 0x35b   :  { %v468_v50 = vadd.f32 %v464_v49, %v226_v48 }
 0x35d   :  { %v472_v51 = vsel %vm375_vm15, %v468_v50, -inf }
 0x35e   :  { %473 = vmax.xlane.f32.xlu0 %v472_v51 }
 0x365   :  { %v521_v21 = vpop.permute.xlu1 %520 }
 0x372   :  { %2083 = vrot.lane.b32.xlu0 %v2082_v52, %s2256_s22 }
 0x398   :  { %v461_v53 = vpop.f32.mrf.mxu1 }
 0x399   :  { %v467_v54 = vmul.f32 0.35355338, %v461_v53 }
 0x39b   :  { %v471_v55 = vadd.f32 %v467_v54, %v226_v48 }
 0x39d   :  { %v481_v56 = vsel %vm375_vm15, %v471_v55, -inf }
 0x39e   :  { %482 = vmax.xlane.f32.xlu1 %v481_v56 }
 0x3c2   :  { %v417_v57 = vpop.f32.mrf.mxu2 }
 0x3c3   :  { %v465_v58 = vmul.f32 0.35355338, %v417_v57 }
 0x3c5   :  { %v469_v59 = vadd.f32 %v465_v58, %v226_v48 }
 0x3c7   :  { %v475_v60 = vsel %vm375_vm15, %v469_v59, -inf }
 0x3c8   :  { %476 = vmax.xlane.f32.xlu2 %v475_v60 }
 0x3ca   :  { %v439_v61 = vpop.f32.mrf.mxu3 }
 0x3cb   :  { %v466_v62 = vmul.f32 0.35355338, %v439_v61 }
 0x3cd   :  { %v470_v63 = vadd.f32 %v466_v62, %v226_v48 }
 0x3cf   :  { %v478_v0 = vsel %vm375_vm15, %v470_v63, -inf }
 0x3d0   :  { %479 = vmax.xlane.f32.xlu1 %v478_v0 }
 0x3d1   :  { %v474_v1 = vpop.xlane.xlu0 %473 }
 0x3d2   :  { %v484_v2 = vsub.f32 %v468_v50, %v474_v1 }
 0x3d4   :  { %v488_v3 = vmul.f32 1.442695, %v484_v2 }
 0x3d6   :  { %2115 = vpow2.f32 %v488_v3 }
 0x3dc   :  { %v2116_v4 = vpop.eup %2115 }
 0x3dd   :  { %v496_v5 = vsel %vm375_vm15, %v2116_v4, 0.0 }
 0x3de   :  { %497 = vadd.xlane.f32.xlu0 %v496_v5 }
 0x3e4   :  { %v2084_v7 = vpop.permute.xlu0 %2083 }
 0x3f1   :  { %528 = vxpose.xlu2.b32.start.end [1/1] (short) (narrow) %v517_v33, 8 }
 0x3f2   :  { %2088 = vrot.lane.b32.xlu0 %v2087_v6, %s2256_s22  ;;  %s2014_s22 = sshll.u32 %s2686_s11, 4  ;;  %s2015_s22 = int_to_ptr.hbm [resolvable:$true] %s2014_s22 }
 0x411   :  { %v483_v22 = vpop.xlane.xlu1 %482 }
 0x412   :  { %v487_v23 = vsub.f32 %v471_v55, %v483_v22  ;;  %v223_v55 = vld [vmem:[#allocation6 + $0x8] sm:$0xff] }
 0x413   :  { %vm225_vm2 = vcmp.eq.s32.totalorder %v223_v55, 0 }
 0x414   :  { %560 = vxpose.xlu0.b32.start.end [1/1] (short) (narrow) %v519_v42, 8  ;;  %v494_v24 = vmul.f32 1.442695, %v487_v23  ;;  %v227_v57 = vsel %vm225_vm2, -1e+09, %v2261_v47 }
 0x41c   :  { %2093 = vxpose.xlu0.b32.start.end [1/1] (short) (narrow) %v2084_v7, 8 }
 0x43b   :  { %v477_v8 = vpop.xlane.xlu2 %476 }
 0x43c   :  { %v485_v9 = vsub.f32 %v469_v59, %v477_v8 }
 0x43e   :  { %v490_v11 = vmul.f32 1.442695, %v485_v9 }
 0x440   :  { %2117 = vpow2.f32 %v490_v11 }
 0x443   :  { %v480_v16 = vpop.xlane.xlu1 %479 }
 0x444   :  { %v486_v25 = vsub.f32 %v470_v63, %v480_v16 }
 0x446   :  { %v2118_v12 = vpop.eup %2117  ;;  %v492_v26 = vmul.f32 1.442695, %v486_v25 }
 0x447   :  { %v499_v13 = vsel %vm375_vm15, %v2118_v12, 0.0 }
 0x448   :  { %500 = vadd.xlane.f32.xlu1 %v499_v13 }
 0x451   :  { %v498_v14 = vpop.xlane.xlu0 %497 }
 0x452   :  { %2119 = vrcp.f32 %v498_v14 }
 0x453   :  { %2121 = vpow2.f32 %v494_v24 }
 0x454   :  { %2123 = vpow2.f32 %v492_v26 }
 0x458   :  { %v2120_v17 = vpop.eup %2119 }
 0x459   :  { %v512_v18 = vmul.f32 %v2120_v17, %v2116_v4  ;;  %v2122_v15 = vpop.eup %2121 }
 0x45a   :  { %522 = vrot.lane.b32.xlu2 %v2394_v28, %s2259_s27  ;;  %v505_v29 = vsel %vm375_vm15, %v2122_v15, 0.0  ;;  %v2124_v30 = vpop.eup %2123 }
 0x45b   :  { %2036 = vmatpush.xpose.msk.msra.mxu2 %vm375_vm15, %v512_v18  ;;  %v502_v28 = vsel %vm375_vm15, %v2124_v30, 0.0 }
 0x464   :  { %v2089_v19 = vpop.permute.xlu0 %2088 }
 0x465   :  { %v2090_v20 = vunpack.i.l.bf16 %v2089_v19  ;;  %v2091_v37 = vunpack.i.h.bf16 %v2089_v19 }
 0x467   :  { %1099 = vxpose.xlu0.b32.start.end [1/1] (short) (narrow) %v2090_v20, 8 }
 0x483   :  { %506 = vadd.xlane.f32.xlu2 %v505_v29 }
 0x48a   :  { %v544_v32 = vpop.trf.xlu2 }
 0x48b   :  { %503 = vadd.xlane.f32.xlu2 %v502_v28  ;;  %2037 = vmatmul.msk.f32.vlgmr.msra.gmra.mxu2 %vm375_vm15, %v544_v32 }
 0x4b4   :  { %v523_v33 = vpop.permute.xlu2 %522  ;;  %592 = vxpose.xlu2.b32.start.end [1/1] (short) (narrow) %v521_v21, 8 }
 0x4b5   :  { %624 = vxpose.xlu1.b32.start.end [1/1] (short) (narrow) %v523_v33, 8 }
 0x4b8   :  { %v576_v35 = vpop.trf.xlu0 }
 0x4bb   :  { %v501_v38 = vpop.xlane.xlu1 %500 }
 0x4bc   :  { %2125 = vrcp.f32 %v501_v38  ;;  %1067 = vxpose.xlu2.b32.start.end [1/1] (short) (narrow) %v2091_v37, 8 }
 0x4c0   :  { %v2094_v39 = vpop.trf.xlu0 }
 0x4c1   :  { %v2095_v42 = vunpack.i.l.bf16 %v2094_v39  ;;  %v2098_v46 = vunpack.i.h.bf16 %v2094_v39 }
 0x4c2   :  { %v2126_v41 = vpop.eup %2125 }
 0x4c3   :  { %v513_v43 = vmul.f32 %v2126_v41, %v2118_v12 }
 0x4c5   :  { %2038 = vmatpush.xpose.msk.msrb.mxu3 %vm375_vm15, %v513_v43 }
 0x4c8   :  { %2039 = vmatmul.msk.f32.vlgmr.msrb.gmra.mxu3 %vm375_vm15, %v576_v35 }
 0x4c9   :  { %1180 = vmatpush.msra.mxu3 %v2095_v42 }
 0x4d0   :  { %2044 = vmatmul.msk.f32.vlgmr.msra.gmra.mxu3 %vm375_vm15, %v2388_v27 }
 0x4f6   :  { %v507_v44 = vpop.xlane.xlu2 %506 }
 0x4f7   :  { %2127 = vrcp.f32 %v507_v44 }
 0x4fd   :  { %v2128_v45 = vpop.eup %2127 }
 0x4fe   :  { %v515_v48 = vmul.f32 %v2128_v45, %v2122_v15  ;;  %v504_v49 = vpop.xlane.xlu2 %503 }
 0x4ff   :  { %2129 = vrcp.f32 %v504_v49 }
 0x500   :  { %2042 = vmatpush.xpose.msk.msrb.mxu2 %vm375_vm15, %v515_v48 }
 0x504   :  { %1246 = vmatpush.msra.mxu2 %v2098_v46 }
 0x505   :  { %v2130_v50 = vpop.eup %2129 }
 0x506   :  { %v514_v51 = vmul.f32 %v2130_v50, %v2124_v30 }
 0x508   :  { %2040 = vmatpush.xpose.msk.msrb.mxu1 %vm375_vm15, %v514_v51 }
 0x50b   :  { %v1115_v52 = vpop.trf.xlu0 }
 0x50c   :  { %1224 = vmatpush.msra.mxu1 %v1115_v52 }
 0x50e   :  { %v2452_v0 = vpop.f32.mrf.mxu2 }
 0x54b   :  { %v2438_v53 = vpop.f32.mrf.mxu3 }
 0x54d   :  { %v608_v54 = vpop.trf.xlu2 }
 0x54e   :  { %2041 = vmatmul.msk.f32.vlgmr.msrb.gmra.mxu1 %vm375_vm15, %v608_v54 }
 0x553   :  { %v1182_v56 = vpop.f32.mrf.mxu3 }
 0x554   :  { %v1251_v58 = vmul.f32 0.35355338, %v1182_v56 }
 0x555   :  { %v1083_v59 = vpop.trf.xlu2 }
 0x556   :  { %1202 = vmatpush.msrb.mxu0 %v1083_v59  ;;  %2046 = vmatmul.msk.f32.vlgmr.msra.gmra.mxu1 %vm375_vm15, %v2403_v36  ;;  %v1255_v60 = vadd.f32 %v1251_v58, %v227_v57 }
 0x557   :  { %2045 = vmatmul.msk.f32.vlgmr.msrb.gmra.mxu0 %vm375_vm15, %v2407_v40 }
 0x558   :  { %v1259_v61 = vsel %vm375_vm15, %v1255_v60, -inf }
 0x559   :  { %1260 = vmax.xlane.f32.xlu0 %v1259_v61  ;;  %v640_v62 = vpop.trf.xlu1  ;;  %v2262_v61 = vmov 1983009808  }
 0x55a   :  { %2043 = vmatmul.msk.f32.vlgmr.msrb.gmra.mxu2 %vm375_vm15, %v640_v62  ;;  %v894_v62 = vunpack.c.l.s4 %v2262_v61 }
 0x562   :  { %2047 = vmatmul.msk.f32.vlgmr.msra.gmra.mxu2 %vm375_vm15, %v2401_v34 }
 0x56d   :  { %1303 = vrot.lane.b32.xlu0 %v2388_v27, %s2259_s27 }
 0x5cb   :  { %v731_v47 = vpop.f32.mrf.mxu1 }
 0x5cc   :  { %v1261_v13 = vpop.xlane.xlu0 %1260 }
 0x5cd   :  { %v1271_v29 = vsub.f32 %v1255_v60, %v1261_v13 }
 0x5cf   :  { %v1275_v30 = vmul.f32 1.442695, %v1271_v29 }
 0x5d3   :  { %v1226_v2 = vpop.f32.mrf.mxu1 }
 0x5d4   :  { %v1204_v63 = vpop.f32.mrf.mxu0  ;;  %v1253_v4 = vmul.f32 0.35355338, %v1226_v2 }
 0x5d5   :  { %v1252_v1 = vmul.f32 0.35355338, %v1204_v63  ;;  %v2477_v63 = vunpack.c.0.s8 %v894_v62 }
 0x5d6   :  { %v1257_v7 = vadd.f32 %v1253_v4, %v227_v57  ;;  %v2263_v4 = vmov 1934713408  }
 0x5d7   :  { %v1256_v3 = vadd.f32 %v1252_v1, %v227_v57 }
 0x5d8   :  { %v1265_v8 = vsel %vm375_vm15, %v1257_v7, -inf }
 0x5d9   :  { %v1262_v5 = vsel %vm375_vm15, %v1256_v3, -inf }
 0x5da   :  { %1263 = vmax.xlane.f32.xlu1 %v1262_v5  ;;  %v918_v5 = vunpack.c.l.s4 %v2263_v4 }
 0x5dd   :  { %v757_v6 = vpop.f32.mrf.mxu2 }
 0x5df   :  { %v1304_v14 = vpop.permute.xlu0 %1303 }
 0x5e2   :  { %1266 = vmax.xlane.f32.xlu1 %v1265_v8 }
 0x5e5   :  { %v1248_v9 = vpop.f32.mrf.mxu2 }
 0x5e6   :  { %v1254_v11 = vmul.f32 0.35355338, %v1248_v9 }
 0x5e8   :  { %v1258_v12 = vadd.f32 %v1254_v11, %v227_v57 }
 0x5ea   :  { %v1268_v27 = vsel %vm375_vm15, %v1258_v12, -inf }
 0x5eb   :  { %1269 = vmax.xlane.f32.xlu2 %v1268_v27  ;;  %v2483_v27 = vunpack.c.0.s8 %v918_v5 }
 0x603   :  { %1309 = vrot.lane.b32.xlu2 %v2401_v34, %s2259_s27 }
 0x60b   :  { %1305 = vrot.lane.b32.xlu2 %v2407_v40, %s2259_s27 }
 0x61c   :  { %1315 = vxpose.xlu1.b32.start.end [1/1] (short) (narrow) %v1304_v14, 8 }
 0x64d   :  { %v1264_v17 = vpop.xlane.xlu1 %1263 }
 0x64e   :  { %v1272_v18 = vsub.f32 %v1256_v3, %v1264_v17 }
 0x650   :  { %v1277_v19 = vmul.f32 1.442695, %v1272_v18 }
 0x652   :  { %2131 = vpow2.f32 %v1277_v19 }
 0x655   :  { %v1267_v20 = vpop.xlane.xlu1 %1266 }
 0x656   :  { %v1273_v21 = vsub.f32 %v1257_v7, %v1267_v20 }
 0x658   :  { %v2132_v22 = vpop.eup %2131  ;;  %v1279_v23 = vmul.f32 1.442695, %v1273_v21 }
 0x659   :  { %v1286_v24 = vsel %vm375_vm15, %v2132_v22, 0.0 }
 0x65a   :  { %2133 = vpow2.f32 %v1279_v23  ;;  %1287 = vadd.xlane.f32.xlu2 %v1286_v24 }
 0x65e   :  { %v1270_v40 = vpop.xlane.xlu2 %1269 }
 0x65f   :  { %v1274_v26 = vsub.f32 %v1258_v12, %v1270_v40 }
 0x660   :  { %v2134_v16 = vpop.eup %2133 }
 0x661   :  { %v1289_v34 = vsel %vm375_vm15, %v2134_v16, 0.0  ;;  %v1281_v15 = vmul.f32 1.442695, %v1274_v26 }
 0x662   :  { %1290 = vadd.xlane.f32.xlu0 %v1289_v34 }
 0x663   :  { %2135 = vpow2.f32 %v1281_v15 }
 0x664   :  { %2137 = vpow2.f32 %v1275_v30 }
 0x666   :  { %v1310_v25 = vpop.permute.xlu2 %1309 }
 0x669   :  { %v2136_v28 = vpop.eup %2135 }
 0x66a   :  { %v1292_v32 = vsel %vm375_vm15, %v2136_v28, 0.0  ;;  %v2138_v33 = vpop.eup %2137 }
 0x66b   :  { %v1283_v35 = vsel %vm375_vm15, %v2138_v33, 0.0 }
 0x676   :  { %1307 = vrot.lane.b32.xlu1 %v2403_v36, %s2259_s27  ;;  %v1306_v36 = vpop.permute.xlu2 %1305 }
 0x68b   :  { %1411 = vxpose.xlu0.b32.start.end [1/1] (short) (narrow) %v1310_v25, 8 }
 0x693   :  { %824 = vxpose.xlu0.b32.start.end [1/1] (short) (narrow) %v731_v47, 8 }
 0x69b   :  { %856 = vxpose.xlu0.b32.start.end [1/1] (short) (narrow) %v757_v6, 8 }
 0x6a0   :  { %1293 = vadd.xlane.f32.xlu1 %v1292_v32 }
 0x6a8   :  { %1284 = vadd.xlane.f32.xlu1 %v1283_v35 }
 0x6c0   :  { %v1331_v44 = vpop.trf.xlu1 }
 0x6cd   :  { %v1288_v37 = vpop.xlane.xlu2 %1287 }
 0x6ce   :  { %2139 = vrcp.f32 %v1288_v37 }
 0x6d4   :  { %v2140_v38 = vpop.eup %2139 }
 0x6d5   :  { %v1300_v39 = vmul.f32 %v2140_v38, %v2132_v22  ;;  %v1291_v41 = vpop.xlane.xlu0 %1290 }
 0x6d6   :  { %2141 = vrcp.f32 %v1291_v41 }
 0x6d7   :  { %2050 = vmatpush.xpose.msk.msra.mxu0 %vm375_vm15, %v1300_v39 }
 0x6dc   :  { %v2142_v42 = vpop.eup %2141 }
 0x6dd   :  { %v1301_v43 = vmul.f32 %v2142_v42, %v2134_v16 }
 0x6df   :  { %2052 = vmatpush.xpose.msk.msrb.mxu1 %vm375_vm15, %v1301_v43 }
 0x6e2   :  { %1347 = vxpose.xlu1.b32.start.end [1/1] (short) (narrow) %v1306_v36, 8 }
 0x6e8   :  { %v1308_v45 = vpop.permute.xlu1 %1307 }
 0x6e9   :  { %1379 = vxpose.xlu2.b32.start.end [1/1] (short) (narrow) %v1308_v45, 8 }
 0x6ea   :  { %760 = vxpose.xlu1.b32.start.end [1/1] (short) (narrow) %v2452_v0, 8 }
 0x6f2   :  { %792 = vxpose.xlu1.b32.start.end [1/1] (short) (narrow) %v2438_v53, 8 }
 0x713   :  { %v1294_v46 = vpop.xlane.xlu1 %1293 }
 0x714   :  { %2143 = vrcp.f32 %v1294_v46 }
 0x71a   :  { %v2144_v48 = vpop.eup %2143 }
 0x71b   :  { %v1302_v49 = vmul.f32 %v2144_v48, %v2136_v28  ;;  %v1285_v50 = vpop.xlane.xlu1 %1284 }
 0x71c   :  { %2145 = vrcp.f32 %v1285_v50 }
 0x71d   :  { %2054 = vmatpush.xpose.msk.msrb.mxu2 %vm375_vm15, %v1302_v49 }
 0x722   :  { %v2146_v51 = vpop.eup %2145 }
 0x723   :  { %v1299_v52 = vmul.f32 %v2146_v51, %v2138_v33 }
 0x725   :  { %2048 = vmatpush.xpose.msk.msrb.mxu3 %vm375_vm15, %v1299_v52 }
 0x728   :  { %2049 = vmatmul.msk.f32.vlgmr.msrb.gmra.mxu3 %vm375_vm15, %v1331_v44 }
 0x72f   :  { %v1427_v54 = vpop.trf.xlu0 }
 0x730   :  { %2055 = vmatmul.msk.f32.vlgmr.msrb.gmra.mxu2 %vm375_vm15, %v1427_v54 }
 0x737   :  { %v840_v58 = vpop.trf.xlu0 }
 0x738   :  { %v888_v60 = vrot.slane %v840_v58, 4 }
 0x73f   :  { %v872_v6 = vpop.trf.xlu0 }
 0x740   :  { %v901_v8 = vrot.slane %v872_v6, 4 }
 0x782   :  { %v1395_v55 = vpop.trf.xlu2 }
 0x783   :  { %2053 = vmatmul.msk.f32.vlgmr.msrb.gmra.mxu1 %vm375_vm15, %v1395_v55 }
 0x786   :  { %v1363_v53 = vpop.trf.xlu1 }
 0x787   :  { %2051 = vmatmul.msk.f32.vlgmr.msra.gmra.mxu0 %vm375_vm15, %v1363_v53 }
 0x78e   :  { %v776_v59 = vpop.trf.xlu1 }
 0x78f   :  { %v891_v47 = vrot.slane %v776_v59, 4  ;;  %v890_v0 = vsel %vm889_vm3, %v888_v60, %v776_v59 }
 0x790   :  { %v896_v2 = vperm.slane %v890_v0, %v2477_v63 }
 0x791   :  { %v892_v1 = vsel %vm889_vm3, %v840_v58, %v891_v47 }
 0x792   :  { %v900_v3 = vperm.slane %v892_v1, %v2477_v63  ;;  %v915_v11 = vrot.slane %v896_v2, 4 }
 0x794   :  { %v927_v12 = vrot.slane %v900_v3, 4 }
 0x796   :  { %v808_v7 = vpop.trf.xlu1 }
 0x797   :  { %v903_v9 = vrot.slane %v808_v7, 4  ;;  %v902_v13 = vsel %vm889_vm3, %v901_v8, %v808_v7 }
 0x798   :  { %v908_v17 = vperm.slane %v902_v13, %v2477_v63 }
 0x799   :  { %v904_v14 = vsel %vm889_vm3, %v872_v6, %v903_v9 }
 0x79a   :  { %v912_v18 = vperm.slane %v904_v14, %v2477_v63  ;;  %v913_v19 = vrot.slane %v908_v17, 4  ;;  %v916_v20 = vsel %vm889_vm3, %v908_v17, %v915_v11 }
 0x79b   :  { %v924_v23 = vperm.slane %v916_v20, %v2483_v27 }
 0x79c   :  { %v925_v21 = vrot.slane %v912_v18, 4  ;;  %v928_v22 = vsel %vm889_vm3, %v912_v18, %v927_v12  ;;  %v914_v16 = vsel %vm889_vm3, %v913_v19, %v896_v2 }
 0x79d   :  { %v936_v24 = vperm.slane %v928_v22, %v2483_v27  ;;  %v920_v40 = vperm.slane %v914_v16, %v2483_v27  ;;  %v939_v26 = vrot.slane %v924_v23, 4  ;;  %v1803_v23 = vld [vmem:[%s2679_s4 + $0x18] sm:$0xff] }
 0x79e   :  { %v926_v34 = vsel %vm889_vm3, %v925_v21, %v900_v3  ;;  %1826 = vmatpush.msra.mxu3 %v1803_v23 }
 0x79f   :  { %v932_v25 = vperm.slane %v926_v34, %v2483_v27  ;;  %v943_v15 = vrot.slane %v936_v24, 4  ;;  %v937_v29 = vrot.slane %v920_v40, 4  ;;  %v940_v30 = vsel %vm889_vm3, 0.0, %v939_v26  ;;  %v1802_v24 = vld [vmem:[%s2679_s4 + $0x10] sm:$0xff] }
 0x7a0   :  { %v945_v33 = vsel %vm889_vm3, %v939_v26, %v920_v40  ;;  %v950_v35 = vrot.slane %v940_v30, 4  ;;  %1827 = vmatpush.msra.mxu3 %v1802_v24 }
 0x7a1   :  { %v941_v28 = vrot.slane %v932_v25, 4  ;;  %v944_v32 = vsel %vm889_vm3, 0.0, %v943_v15  ;;  %v956_v37 = vsel %vm889_vm3, %v943_v15, %v932_v25  ;;  %v938_v38 = vsel %vm889_vm3, 0.0, %v937_v29  ;;  %v1801_v15 = vld [vmem:[%s2679_s4 + $0x8] sm:$0xff] }
 0x7a2   :  { %v961_v36 = vrot.slane %v944_v32, 4  ;;  %v949_v41 = vperm.slane %v945_v33, %v2477_v63  ;;  %v960_v42 = vperm.slane %v956_v37, %v2477_v63  ;;  %v951_v43 = vsel %vm889_vm3, %v950_v35, %v938_v38  ;;  %1828 = vmatpush.msra.mxu3 %v1801_v15 }
 0x7a3   :  { %v942_v39 = vsel %vm889_vm3, 0.0, %v941_v28  ;;  %v955_v46 = vperm.slane %v951_v43, %v2477_v63 }
 0x7a4   :  { %v962_v44 = vsel %vm889_vm3, %v961_v36, %v942_v39  ;;  %v981_v49 = vrot.slane %v960_v42, 4  ;;  %v969_v50 = vrot.slane %v949_v41, 4  ;;  %v1800_v39 = vld [vmem:[%s2679_s4] sm:$0xff] }
 0x7a5   :  { %v966_v48 = vperm.slane %v962_v44, %v2477_v63  ;;  %v967_v53 = vrot.slane %v955_v46, 4  ;;  %1829 = vmatpush.msra.mxu3 %v1800_v39 }
 0x7a6   :  { %v970_v51 = vsel %vm889_vm3, %v955_v46, %v969_v50 }
 0x7a7   :  { %v982_v52 = vsel %vm889_vm3, %v966_v48, %v981_v49  ;;  %v978_v54 = vperm.slane %v970_v51, %v2483_v27  ;;  %v968_v61 = vsel %vm889_vm3, %v967_v53, %v949_v41  ;;  %v979_v62 = vrot.slane %v966_v48, 4 }
 0x7a8   :  { %v990_v55 = vperm.slane %v982_v52, %v2483_v27  ;;  %v2518_v47 = vperm.slane %v968_v61, %v2483_v27 }
 0x7a9   :  { %v980_v0 = vsel %vm889_vm3, %v979_v62, %v960_v42 }
 0x7aa   :  { %v2522_v1 = vperm.slane %v980_v0, %v2483_v27  ;;  %v993_v2 = vrot.slane %v2518_v47, 4 }
 0x7ab   :  { %v1466_v56 = vpop.f32.mrf.mxu3 }
 0x7ac   :  { %1547 = vxpose.xlu0.b32.start.end [1/1] (short) (narrow) %v1466_v56, 8  ;;  %v995_v56 = vrot.slane %v990_v55, 4  ;;  %v994_v3 = vsel %vm889_vm3, %v2522_v1, %v993_v2 }
 0x7ae   :  { %v996_v59 = vsel %vm889_vm3, %v995_v56, %v978_v54 }
 0x7b3   :  { %v1544_v57 = vpop.f32.mrf.mxu2 }
 0x7b4   :  { %1643 = vxpose.xlu1.b32.start.end [1/1] (short) (narrow) %v1544_v57, 8  ;;  %v997_v57 = vrot.slane %v978_v54, 4 }
 0x7b6   :  { %v998_v60 = vsel %vm889_vm3, %v990_v55, %v997_v57 }
 0x800   :  { %v1518_v58 = vpop.f32.mrf.mxu1 }
 0x804   :  { %v1492_v45 = vpop.f32.mrf.mxu0 }
 0x805   :  { %1579 = vxpose.xlu2.b32.start.end [1/1] (short) (narrow) %v1492_v45, 8 }
 0x80d   :  { %1611 = vxpose.xlu2.b32.start.end [1/1] (short) (narrow) %v1518_v58, 8 }
 0x80e   :  { %1004 = vrot.lane.b32.xlu1 %v996_v59, %s2264_s3 }
 0x81a   :  { %1000 = vrot.lane.b32.xlu0 %v994_v3, %s2251_s26 }
 0x850   :  { %v1563_v9 = vpop.trf.xlu0 }
 0x851   :  { %v1677_v11 = vrot.slane %v1563_v9, 4 }
 0x858   :  { %v1659_v4 = vpop.trf.xlu1 }
 0x859   :  { %v1687_v7 = vrot.slane %v1659_v4, 4 }
 0x876   :  { %1008 = vrot.lane.b32.xlu2 %v998_v60, %s2265_s29 }
 0x89e   :  { %v1595_v5 = vpop.trf.xlu2 }
 0x89f   :  { %v1689_v6 = vrot.slane %v1595_v5, 4  ;;  %v1688_v12 = vsel %vm889_vm3, %v1687_v7, %v1595_v5 }
 0x8a0   :  { %v1694_v17 = vperm.slane %v1688_v12, %v2477_v63 }
 0x8a1   :  { %v1690_v8 = vsel %vm889_vm3, %v1659_v4, %v1689_v6 }
 0x8a2   :  { %v1698_v13 = vperm.slane %v1690_v8, %v2477_v63  ;;  %v1699_v40 = vrot.slane %v1694_v17, 4 }
 0x8a4   :  { %v1711_v21 = vrot.slane %v1698_v13, 4 }
 0x8a6   :  { %v1627_v14 = vpop.trf.xlu2 }
 0x8a7   :  { %v1675_v18 = vrot.slane %v1627_v14, 4  ;;  %v1678_v19 = vsel %vm889_vm3, %v1627_v14, %v1677_v11 }
 0x8a8   :  { %v1686_v20 = vperm.slane %v1678_v19, %v2477_v63 }
 0x8a9   :  { %v1676_v22 = vsel %vm889_vm3, %v1675_v18, %v1563_v9 }
 0x8aa   :  { %v1682_v16 = vperm.slane %v1676_v22, %v2477_v63  ;;  %v1713_v34 = vrot.slane %v1686_v20, 4  ;;  %v1712_v25 = vsel %vm889_vm3, %v1711_v21, %v1686_v20  ;;  %v1005_v21 = vpop.permute.xlu1 %1004 }
 0x8ab   :  { %v1718_v26 = vperm.slane %v1712_v25, %v2483_v27 }
 0x8ac   :  { %v1701_v29 = vrot.slane %v1682_v16, 4  ;;  %v1700_v30 = vsel %vm889_vm3, %v1699_v40, %v1682_v16  ;;  %v1714_v28 = vsel %vm889_vm3, %v1698_v13, %v1713_v34  ;;  %v991_v13 = vrot.slane %v2522_v1, 4 }
 0x8ad   :  { %v1706_v32 = vperm.slane %v1700_v30, %v2483_v27  ;;  %v1722_v33 = vperm.slane %v1714_v28, %v2483_v27  ;;  %v1727_v37 = vrot.slane %v1718_v26, 4  ;;  %v2155_v30 = vld [vmem:[#allocation2] sm:$0xff] }
 0x8ae   :  { %v1702_v35 = vsel %vm889_vm3, %v1694_v17, %v1701_v29  ;;  %v1001_v17 = vpop.permute.xlu0 %1000  ;;  %v992_v18 = vsel %vm889_vm3, %v991_v13, %v2518_v47 }
 0x8af   :  { %v1710_v36 = vperm.slane %v1702_v35, %v2483_v27  ;;  %v1729_v38 = vrot.slane %v1722_v33, 4  ;;  %v1723_v41 = vrot.slane %v1706_v32, 4  ;;  %v1728_v48 = vsel %vm889_vm3, 0.0, %v1727_v37 }
 0x8b0   :  { %v1011_v20 = vsel %vm375_vm15, %v992_v18, %v1001_v17 }
 0x8b1   :  { %v1725_v42 = vrot.slane %v1710_v36, 4  ;;  %v1730_v43 = vsel %vm889_vm3, 0.0, %v1729_v38  ;;  %v1742_v45 = vsel %vm889_vm3, %v1729_v38, %v1718_v26  ;;  %v1724_v51 = vsel %vm889_vm3, 0.0, %v1723_v41  ;;  %v2100_v26 = vld [vmem:[%s2680_s5] ss:$0 sm:$0xff]  ;;  %v2156_v36 = vld [vmem:[#allocation2 + $0x8] sm:$0xff] }
 0x8b2   :  { %v1747_v44 = vrot.slane %v1730_v43, 4  ;;  %v1746_v52 = vperm.slane %v1742_v45, %v2477_v63  ;;  %v1013_v22 = vsel %vm1012_vm4, %v1011_v20, %v1005_v21 }
 0x8b3   :  { %v1726_v46 = vsel %vm889_vm3, 0.0, %v1725_v42  ;;  %v1731_v55 = vsel %vm889_vm3, %v1725_v42, %v1706_v32 }
 0x8b4   :  { %v1736_v49 = vrot.slane %v1726_v46, 4  ;;  %v1748_v50 = vsel %vm889_vm3, %v1747_v44, %v1728_v48  ;;  %v1735_v58 = vperm.slane %v1731_v55, %v2477_v63  ;;  %v1767_v61 = vrot.slane %v1746_v52, 4  ;;  %v1926_v48 = vld [vmem:[%s2681_s6 + $0x18] sm:$0xff] }
 0x8b5   :  { %v1752_v54 = vperm.slane %v1748_v50, %v2477_v63  ;;  %1949 = vmatpush.msrb.mxu0 %v1926_v48 }
 0x8b6   :  { %v1737_v53 = vsel %vm889_vm3, %v1736_v49, %v1724_v51  ;;  %v1755_v4 = vrot.slane %v1735_v58, 4  ;;  %v1925_v49 = vld [vmem:[%s2681_s6 + $0x10] sm:$0xff]  ;;  %v1924_v51 = vld [vmem:[%s2681_s6 + $0x8] sm:$0xff] }
 0x8b7   :  { %v1741_v56 = vperm.slane %v1737_v53, %v2477_v63  ;;  %v1765_v57 = vrot.slane %v1752_v54, 4  ;;  %v1768_v5 = vsel %vm889_vm3, %v1752_v54, %v1767_v61  ;;  %1950 = vmatpush.msrb.mxu0 %v1925_v49 }
 0x8b8   :  { %v1776_v63 = vperm.slane %v1768_v5, %v2483_v27 }
 0x8b9   :  { %v1753_v59 = vrot.slane %v1741_v56, 4  ;;  %v1766_v60 = vsel %vm889_vm3, %v1765_v57, %v1746_v52  ;;  %v1756_v9 = vsel %vm889_vm3, %v1741_v56, %v1755_v4  ;;  %1951 = vmatpush.msrb.mxu0 %v1924_v51 }
 0x8ba   :  { %v1772_v62 = vperm.slane %v1766_v60, %v2483_v27  ;;  %v1764_v11 = vperm.slane %v1756_v9, %v2483_v27  ;;  %v1781_v12 = vrot.slane %v1776_v63, 4 }
 0x8bb   :  { %v1754_v0 = vsel %vm889_vm3, %v1753_v59, %v1735_v58 }
 0x8bc   :  { %v1760_v2 = vperm.slane %v1754_v0, %v2483_v27  ;;  %v1777_v3 = vrot.slane %v1772_v62, 4  ;;  %v1782_v14 = vsel %vm889_vm3, %v1781_v12, %v1764_v11  ;;  %v1783_v19 = vrot.slane %v1764_v11, 4 }
 0x8be   :  { %v1779_v6 = vrot.slane %v1760_v2, 4  ;;  %v1778_v7 = vsel %vm889_vm3, %v1777_v3, %v1760_v2  ;;  %v1784_v27 = vsel %vm889_vm3, %v1776_v63, %v1783_v19  ;;  %v1920_v19 = vstv %s2627_s23 }
 0x8c0   :  { %v1780_v8 = vsel %vm889_vm3, %v1772_v62, %v1779_v6  ;;  %vm1974_vm3 = vcmask 523264  }
 0x8c1   :  { %1786 = vrot.lane.b32.xlu1 %v1780_v8, %s2251_s26 }
 0x8c9   :  { %1790 = vrot.lane.b32.xlu1 %v1782_v14, %s2264_s3 }
 0x8d0   :  { %v1009_v23 = vpop.permute.xlu2 %1008 }
 0x8d1   :  { %v1015_v24 = vsel %vm1014_vm5, %v1013_v22, %v1009_v23  ;;  %1794 = vrot.lane.b32.xlu1 %v1784_v27, %s2265_s29 }
 0x8d2   :  { %2056 = vmatmul.msk.f32.vlgmr.msra.gmra.mxu3 %vm88_vm0, %v1015_v24 }
 0x933   :  { %v1787_v1 = vpop.permute.xlu1 %1786 }
 0x934   :  { %v1797_v34 = vsel %vm375_vm15, %v1778_v7, %v1787_v1 }
 0x93b   :  { %v1791_v16 = vpop.permute.xlu1 %1790 }
 0x93c   :  { %v1798_v47 = vsel %vm1012_vm4, %v1797_v34, %v1791_v16  ;;  %v1969_v34 = vld [vmem:[%s2683_s8 + $0x38] sm:$0xff] }
 0x93d   :  { %1989 = vmatpush.msra.mxu1 %v1969_v34 }
 0x943   :  { %v1795_v40 = vpop.permute.xlu1 %1794 }
 0x944   :  { %v1799_v25 = vsel %vm1014_vm5, %v1798_v47, %v1795_v40  ;;  %v1968_v47 = vld [vmem:[%s2683_s8 + $0x30] sm:$0xff] }
 0x945   :  { %2057 = vmatmul.msk.f32.gmra.mxu3 %vm88_vm0, %v1799_v25  ;;  %v1967_v25 = vld [vmem:[%s2683_s8 + $0x28] sm:$0xff]  ;;  %1990 = vmatpush.msra.mxu1 %v1968_v47 }
 0x947   :  { %1991 = vmatpush.msra.mxu1 %v1967_v25 }
 0x955   :  { %v1831_v15 = vpop.f32.mrf.mxu3 }
 0x956   :  { %v1832_v29 = vadd.f32 %v2100_v26, %v1831_v15 }
 0x958   :  { %v2594_v28 = vadd.f32 %v2155_v30, %v1832_v29  ;;  %v1965_v29 = vld [vmem:[%s2683_s8 + $0x18] sm:$0xff] }
 0x95a   :  { %v1841_v32 = vsel %vm88_vm0, %v2594_v28, 0.0 }
 0x95b   :  { %1842 = vadd.xlane.f32.xlu0 %v1841_v32 }
 0x9c8   :  { %v1834_v33 = vpop.f32.mrf.mxu3 }
 0x9c9   :  { %v1835_v35 = vadd.f32 %v2100_v26, %v1834_v33  ;;  %v1966_v26 = vld [vmem:[%s2683_s8 + $0x20] sm:$0xff] }
 0x9ca   :  { %1992 = vmatpush.msra.mxu1 %v1966_v26 }
 0x9cb   :  { %v2598_v37 = vadd.f32 %v2156_v36, %v1835_v35  ;;  %v1964_v36 = vld [vmem:[%s2683_s8 + $0x10] sm:$0xff] }
 0x9cc   :  { %1993 = vmatpush.msra.mxu1 %v1965_v29 }
 0x9cd   :  { %v1844_v38 = vsel %vm88_vm0, %v2598_v37, 0.0 }
 0x9ce   :  { %v1843_v39 = vpop.xlane.xlu0 %1842  ;;  %1845 = vadd.xlane.f32.xlu2 %v1844_v38  ;;  %1994 = vmatpush.msra.mxu1 %v1964_v36  ;;  %v1963_v38 = vld [vmem:[%s2683_s8 + $0x8] sm:$0xff] }
 0x9cf   :  { %v1847_v41 = vmul.f32 %v1843_v39, %v2344_v10  ;;  %v1962_v39 = vld [vmem:[%s2683_s8] sm:$0xff] }
 0x9d0   :  { %1995 = vmatpush.msra.mxu1 %v1963_v38 }
 0x9d1   :  { %v1849_v42 = vsub.f32 %v2594_v28, %v1847_v41 }
 0x9d2   :  { %1996 = vmatpush.msra.mxu1 %v1962_v39 }
 0x9d3   :  { %v1851_v43 = vmul.f32 %v1849_v42, %v1849_v42 }
 0x9d5   :  { %v1853_v44 = vsel %vm88_vm0, %v1851_v43, 0.0 }
 0x9d6   :  { %1854 = vadd.xlane.f32.xlu1 %v1853_v44 }
 0xa41   :  { %v1846_v45 = vpop.xlane.xlu2 %1845 }
 0xa42   :  { %v1848_v46 = vmul.f32 %v1846_v45, %v2344_v10  ;;  %v1923_v10 = vld [vmem:[%s2681_s6] sm:$0xff]  ;;  %s2625_s6 = sld [smem:[#allocation8 + $0x2]] }
 0xa43   :  { %1952 = vmatpush.msrb.mxu0 %v1923_v10 }
 0xa44   :  { %v2613_v50 = vsub.f32 %v2598_v37, %v1848_v46 }
 0xa46   :  { %v1852_v52 = vmul.f32 %v2613_v50, %v2613_v50 }
 0xa48   :  { %v1856_v54 = vsel %vm88_vm0, %v1852_v52, 0.0  ;;  %v1885_v11 = vstv %s2625_s6 }
 0xa49   :  { %1857 = vadd.xlane.f32.xlu2 %v1856_v54  ;;  %v1855_v55 = vpop.xlane.xlu1 %1854  ;;  %v1886_v14 = vmul.f32 %v1885_v11, %v1849_v42  ;;  %v1887_v51 = vmul.f32 %v1885_v11, %v2613_v50  ;;  %v2102_v50 = vld [vmem:[%s2684_s9] ss:$0 sm:$0xff] }
 0xa4a   :  { %v1859_v53 = vmul.f32 %v1855_v55, %v2370_v31 }
 0xa4c   :  { %2147 = vrsqrt.f32 %v1859_v53  ;;  %vm1868_vm6 = vcmp.eq.f32.partialorder %v1859_v53, inf  ;;  %v1871_v0 = vand.u32 2147483648, %v1859_v53  ;;  %vm1870_vm7 = vcmp.eq.f32.partialorder %v1859_v53, 0.0 }
 0xa52   :  { %v2148_v56 = vpop.eup %2147 }
 0xa53   :  { %v1862_v57 = vmul.f32 %v2148_v56, %v1859_v53 }
 0xa55   :  { %v1863_v58 = vmul.f32 %v2148_v56, %v1862_v57 }
 0xa57   :  { %v1864_v59 = vmul.f32 0.5, %v1863_v58 }
 0xa59   :  { %v1865_v60 = vsub.f32 1.5, %v1864_v59 }
 0xa5b   :  { %v1866_v61 = vmul.f32 %v2148_v56, %v1865_v60 }
 0xa5d   :  { %v1867_v62 = vmul.f32 %v1866_v61, %v1859_v53 }
 0xa5f   :  { %v1869_v2 = vsel %vm1868_vm6, %v1859_v53, %v1867_v62  ;;  %v2101_v53 = vld [vmem:[%s2682_s7] ss:$0 sm:$0xff]  ;;  %s2266_s7 = smov [#allocation9]  }
 0xa60   :  { %v1872_v3 = vsel %vm1870_vm7, %v1871_v0, %v1869_v2  ;;  %s2012_s19 = sshll.u32 %s2266_s7, 4  ;;  %s2013_s19 = int_to_ptr.vmem [resolvable:$true] %s2012_s19 }
 0xa61   :  { %v1888_v4 = vadd.f32 1e-06, %v1872_v3 }
 0xa63   :  { %2149 = vrcp.f32 %v1888_v4  ;;  %v1901_v8 = vand.u32 2147483648, %v1888_v4  ;;  %v1899_v9 = vand.u32 2147483647, %v1888_v4  ;;  %vm1895_vm9 = vweird.f32 %v1888_v4 }
 0xa65   :  { %v1902_v13 = vor.u32 1.1754944e-38, %v1901_v8  ;;  %vm1900_vm11 = vcmp.eq.f32.partialorder %v1899_v9, 8.507059e+37 }
 0xa69   :  { %v2150_v5 = vpop.eup %2149 }
 0xa6a   :  { %v1891_v6 = vmul.f32 %v2150_v5, %v1888_v4  ;;  %vm1896_vm8 = vweird.f32 %v2150_v5 }
 0xa6b   :  { %vm1897_vm10 = vmor %vm1895_vm9, %vm1896_vm8 }
 0xa6c   :  { %v1892_v7 = vsub.f32 1.0, %v1891_v6 }
 0xa6e   :  { %v1893_v63 = vmul.f32 %v2150_v5, %v1892_v7 }
 0xa70   :  { %v1894_v12 = vadd.f32 %v2150_v5, %v1893_v63 }
 0xa72   :  { %v1898_v17 = vsel %vm1897_vm10, %v2150_v5, %v1894_v12 }
 0xa73   :  { %v1903_v18 = vsel %vm1900_vm11, %v1902_v13, %v1898_v17 }
 0xa74   :  { %v1904_v20 = vmul.f32 %v1903_v18, %v1886_v14 }
 0xa76   :  { %v1921_v21 = vadd.f32 %v1920_v19, %v1904_v20 }
 0xa78   :  { %2060 = vmatmul.msk.f32.vlgmr.msrb.gmra.mxu0 %vm88_vm0, %v1921_v21 }
 0xabc   :  { %v1858_v22 = vpop.xlane.xlu2 %1857 }
 0xabd   :  { %v1860_v23 = vmul.f32 %v1858_v22, %v2370_v31 }
 0xabf   :  { %2151 = vrsqrt.f32 %v1860_v23  ;;  %vm1880_vm12 = vcmp.eq.f32.partialorder %v1860_v23, inf  ;;  %v1883_v30 = vand.u32 2147483648, %v1860_v23  ;;  %vm1882_vm13 = vcmp.eq.f32.partialorder %v1860_v23, 0.0 }
 0xac5   :  { %v2152_v27 = vpop.eup %2151 }
 0xac6   :  { %v1874_v24 = vmul.f32 %v2152_v27, %v1860_v23 }
 0xac8   :  { %v1875_v1 = vmul.f32 %v2152_v27, %v1874_v24 }
 0xaca   :  { %v1876_v16 = vmul.f32 0.5, %v1875_v1 }
 0xacc   :  { %v1877_v40 = vsub.f32 1.5, %v1876_v16 }
 0xace   :  { %v1878_v31 = vmul.f32 %v2152_v27, %v1877_v40 }
 0xad0   :  { %v1879_v15 = vmul.f32 %v1878_v31, %v1860_v23 }
 0xad2   :  { %v1881_v32 = vsel %vm1880_vm12, %v1860_v23, %v1879_v15 }
 0xad3   :  { %v1884_v33 = vsel %vm1882_vm13, %v1883_v30, %v1881_v32 }
 0xad4   :  { %v1889_v35 = vadd.f32 1e-06, %v1884_v33 }
 0xad6   :  { %2153 = vrcp.f32 %v1889_v35  ;;  %v1916_v44 = vand.u32 2147483648, %v1889_v35  ;;  %v1914_v46 = vand.u32 2147483647, %v1889_v35  ;;  %vm1910_vm15 = vweird.f32 %v1889_v35 }
 0xad8   :  { %v1917_v49 = vor.u32 1.1754944e-38, %v1916_v44  ;;  %vm1915_vm2 = vcmp.eq.f32.partialorder %v1914_v46, 8.507059e+37 }
 0xadc   :  { %v2154_v41 = vpop.eup %2153 }
 0xadd   :  { %v1906_v42 = vmul.f32 %v2154_v41, %v1889_v35  ;;  %vm1911_vm14 = vweird.f32 %v2154_v41 }
 0xade   :  { %vm1912_vm1 = vmor %vm1910_vm15, %vm1911_vm14 }
 0xadf   :  { %v1907_v43 = vsub.f32 1.0, %v1906_v42 }
 0xae1   :  { %v1908_v45 = vmul.f32 %v2154_v41, %v1907_v43 }
 0xae3   :  { %v1909_v48 = vadd.f32 %v2154_v41, %v1908_v45 }
 0xae5   :  { %v1913_v52 = vsel %vm1912_vm1, %v2154_v41, %v1909_v48 }
 0xae6   :  { %v1918_v10 = vsel %vm1915_vm2, %v1917_v49, %v1913_v52 }
 0xae7   :  { %v1919_v54 = vmul.f32 %v1918_v10, %v1887_v51 }
 0xae9   :  { %v1922_v55 = vadd.f32 %v1920_v19, %v1919_v54 }
 0xaeb   :  { %2061 = vmatmul.msk.f32.gmra.mxu0 %vm88_vm0, %v1922_v55 }
 0xaf5   :  { %v1954_v56 = vpop.f32.mrf.mxu0 }
 0xaf6   :  { %v1955_v57 = vadd.f32 %v2101_v53, %v1954_v56 }
 0xaf8   :  { %v1960_v58 = vmax.f32 %v1955_v57, 0.0 }
 0xafa   :  { %2062 = vmatmul.msk.f32.vlgmr.msra.gmra.mxu1 %vm1974_vm3, %v1960_v58 }
 0xb68   :  { %v1957_v59 = vpop.f32.mrf.mxu0 }
 0xb69   :  { %v1958_v60 = vadd.f32 %v2101_v53, %v1957_v59 }
 0xb6b   :  { %v1961_v61 = vmax.f32 %v1958_v60, 0.0 }
 0xb6d   :  { %2063 = vmatmul.msk.f32.gmra.mxu1 %vm1974_vm3, %v1961_v61 }
 0xb77   :  { %v1998_v62 = vpop.f32.mrf.mxu1 }
 0xb78   :  { %v1999_v0 = vadd.f32 %v2102_v50, %v1998_v62 }
 0xb7a   :  { %v2004_v2 = vadd.f32 %v1999_v0, %v2594_v28 }
 0xb7c   :  { %2006 = vst.msk [vmem:[#allocation9] sm:$0xff] %vm88_vm0, %v2004_v2 }
 0xbea   :  { %v2001_v3 = vpop.f32.mrf.mxu1 }
 0xbeb   :  { %v2002_v4 = vadd.f32 %v2102_v50, %v2001_v3 }
 0xbed   :  { %v2005_v5 = vadd.f32 %v2002_v4, %v2598_v37 }
 0xbef   :  { %2007 = vst.msk [vmem:[#allocation9 + $0x8] sm:$0xff] %vm88_vm0, %v2005_v5 }
 0xbf0   :  { %2020 = dma.vmem_to_hbm [thread:$0]  %s2013_s19, 256, %s2015_s22, [#allocation4], %s2250_s25, %s2250_s25, %s2251_s26  }
 0xbf1   :  { %2247 = dma.done.wait [#allocation4], 256  }
 0xbf2   :  { %2248 = vsyncadd [#allocation4], 4294967040 }
 0xbf3   :  { %2025 = vsyncpa [#allocation3], 1 }
 0xbf4   :  { %2026 = vsyncpa [#allocation7], 1 }
 0xbf5   :  { %2027 = vsyncpa [#allocation4], 1 }
 0xbf6   :  { %2028 = vsyncpa [#allocation5], 1 }

</bundles_post_ra>
